<compile_context>
chip_gen: v7x
topology: tpu7x:2x2x1
jax: 0.10.0
libtpu: 0.0.40
codegen_flags: <defaults>
</compile_context>

<pallas_src>
import functools

import jax
import jax.numpy as jnp
import numpy as np
from jax.experimental import pallas as pl
from jax.experimental.pallas import tpu as pltpu


def _round_up(x, m):
    return (x + m - 1) // m * m


# ---------------------------------------------------------------------------
# Fused Pallas kernel: logits tile = x_tile @ w_tile.T   +   online LSE
# grid = (M // tm  [parallel],  V // block_v  [arbitrary: LSE reduction])
# ---------------------------------------------------------------------------
def _matmul_lse_kernel(x_ref, w_ref, logits_ref, lse_ref, m_sc, l_sc, *,
                       valid_v, block_v, mask_cols):
    j = pl.program_id(1)

    @pl.when(j == 0)
    def _():
        m_sc[...] = jnp.full(m_sc.shape, -jnp.inf, m_sc.dtype)
        l_sc[...] = jnp.zeros(l_sc.shape, l_sc.dtype)

    # x: (tm, H), w: (block_v, H)  ->  logits: (tm, block_v), f32 acc on MXU.
    logits = jax.lax.dot_general(
        x_ref[...], w_ref[...],
        dimension_numbers=(((1,), (1,)), ((), ())),   # contract hidden dims
        preferred_element_type=jnp.float32,
    )

    if mask_cols:
        # TP-padding rows of the weight / vocab-tile remainder: force -inf so
        # they contribute 0 to the LSE and never win top-k (this is the
        # reference's `[:, :vocab_size]` slice, done in-kernel with no copy).
        col = jax.lax.broadcasted_iota(jnp.int32, logits.shape, 1) + j * block_v
        logits = jnp.where(col < valid_v, logits, -jnp.inf)

    logits_ref[...] = logits

    # Online log-sum-exp update: exp/log go to the EUP slot and the cross-lane
    # max/sum go to the XLU slot — effectively free in an MXU-bound kernel.
    m_prev = m_sc[...]
    m_new = jnp.maximum(m_prev, jnp.max(logits, axis=-1, keepdims=True))
    l_sc[...] = (l_sc[...] * jnp.exp(m_prev - m_new)
                 + jnp.sum(jnp.exp(logits - m_new), axis=-1, keepdims=True))
    m_sc[...] = m_new

    @pl.when(j == pl.num_programs(1) - 1)
    def _():
        lse_ref[...] = m_sc[...] + jnp.log(l_sc[...])


def _vmem_bytes(tm, tv, h, x_bytes, w_bytes):
    # double-buffered input blocks + double-buffered logits output block
    return 2 * tm * h * x_bytes + 2 * tv * h * w_bytes + 2 * tm * tv * 4


def matmul_logits_lse(x, w, valid_v, *, tm=256, block_v=512,
                      vmem_budget=36 * 1024 * 1024):
    """x: [M, H], w: [Vw, H] (Vw >= valid_v) ->
         logits [M, V_pad] f32  (columns >= valid_v are -inf),
         lse    [M, 1]     f32  (= logsumexp(logits[:, :valid_v], axis=-1)).
    """
    M, H = x.shape
    Vw, H2 = w.shape
    assert H == H2 and valid_v <= Vw

    # Vocab tile: largest of 512/256/128 dividing the weight rows (embedding
    # tables are normally padded to a multiple of 128).
    for t in (512, 256, 128):
        if Vw % t == 0:
            block_v = min(block_v, t)
            break
    else:
        # Rare fallback: uneven last weight block; overhang values are
        # unspecified on read but always masked to -inf in the kernel.
        block_v = min(block_v, _round_up(Vw, 128))
    V_pad = _round_up(Vw, block_v)

    # Row tile + VMEM fitting (v7x only has 64 MiB of VMEM per TensorCore).
    tm = min(tm, _round_up(M, 8))
    xb, wb = x.dtype.itemsize, w.dtype.itemsize
    while _vmem_bytes(tm, block_v, H, xb, wb) > vmem_budget and tm > 64:
        tm //= 2
    while _vmem_bytes(tm, block_v, H, xb, wb) > vmem_budget and block_v > 128:
        block_v //= 2
        V_pad = _round_up(Vw, block_v)

    M_pad = _round_up(M, tm)
    if M_pad != M:
        x = jnp.pad(x, ((0, M_pad - M), (0, 0)))

    mask_cols = (valid_v != V_pad)
    kernel = functools.partial(_matmul_lse_kernel, valid_v=valid_v,
                               block_v=block_v, mask_cols=mask_cols)

    logits, lse = pl.pallas_call(
        kernel,
        out_shape=(
            jax.ShapeDtypeStruct((M_pad, V_pad), jnp.float32),
            jax.ShapeDtypeStruct((M_pad, 1), jnp.float32),
        ),
        grid_spec=pltpu.PrefetchScalarGridSpec(
            num_scalar_prefetch=0,
            grid=(M_pad // tm, V_pad // block_v),
            in_specs=[
                pl.BlockSpec((tm, H), lambda i, j: (i, 0)),        # token rows
                pl.BlockSpec((block_v, H), lambda i, j: (j, 0)),   # vocab rows
            ],
            out_specs=(
                pl.BlockSpec((tm, block_v), lambda i, j: (i, j)),  # logits tile
                pl.BlockSpec((tm, 1), lambda i, j: (i, 0)),        # lse (resident over j)
            ),
            scratch_shapes=[
                pltpu.VMEM((tm, 1), jnp.float32),                  # running max
                pltpu.VMEM((tm, 1), jnp.float32),                  # running sum
            ],
        ),
        compiler_params=pltpu.CompilerParams(
            dimension_semantics=("parallel", "arbitrary"),
            vmem_limit_bytes=48 * 1024 * 1024,
        ),
    )(x, w)

    if M_pad != M:
        logits = logits[:M]
        lse = lse[:M]
    return logits, lse


# ---------------------------------------------------------------------------
# Plain-JAX glue matching the PyTorch module semantics (EXTEND + logprobs)
# ---------------------------------------------------------------------------
def _get_normalized_prompt_logprobs(prefill_token_logprobs, extend_start_loc,
                                    extend_seq_lens):
    n = prefill_token_logprobs.shape[0]
    logprobs_cumsum = jnp.cumsum(prefill_token_logprobs, dtype=jnp.float32)
    start = jnp.clip(extend_start_loc, 0, n - 1)
    end = jnp.clip(extend_start_loc + extend_seq_lens - 2, 0, n - 1)
    sum_logp = (logprobs_cumsum[end] - logprobs_cumsum[start]
                + prefill_token_logprobs[start])
    denom = jnp.clip(extend_seq_lens - 1, 1, None).astype(jnp.float32)
    return sum_logp / denom


@functools.partial(jax.jit,
                   static_argnames=("vocab_size", "final_logit_softcapping",
                                    "kmax"))
def _device_forward(input_ids, hidden_states, weight, extend_seq_lens,
                    extend_start_loc, *, vocab_size, final_logit_softcapping,
                    kmax):
    # Fused hot path: logits of ALL prompt tokens + per-row log-sum-exp.
    all_logits, lse = matmul_logits_lse(hidden_states, weight, vocab_size)

    # Last token of each extended sequence: single gather, no second matmul.
    last_index = jnp.cumsum(extend_seq_lens.astype(jnp.int32)) - 1
    last_rows = all_logits[last_index][:, :vocab_size]
    last_lse = lse[last_index]

    if final_logit_softcapping is not None:
        last_logits = final_logit_softcapping * jnp.tanh(
            last_rows * (1.0 / final_logit_softcapping))
    else:
        last_logits = last_rows
    last_logprobs = last_rows - last_lse          # logprob = logit - lse

    # Prefill token logprobs: logprob of the *next* token at every position.
    shifted_ids = jnp.concatenate(
        [input_ids[1:], jnp.zeros((1,), input_ids.dtype)]).astype(jnp.int32)
    gathered = jnp.take_along_axis(all_logits, shifted_ids[:, None], axis=1)[:, 0]
    prefill_token_logprobs = gathered - lse[:, 0]

    normalized_prompt_logprobs = _get_normalized_prompt_logprobs(
        prefill_token_logprobs, extend_start_loc, extend_seq_lens)

    if kmax > 0:
        # One batched top-k over logits (same ranking as logprobs), then shift
        # by lse — masked (-inf) pad columns can never win.
        topk_vals, topk_idx = jax.lax.top_k(all_logits, kmax)
        topk_vals = topk_vals - lse
    else:
        topk_vals = topk_idx = None

    return dict(
        next_token_logits=last_logits,
        next_token_logprobs=last_logprobs,
        normalized_prompt_logprobs=normalized_prompt_logprobs,
        prefill_token_logprobs=prefill_token_logprobs,
        topk_vals=topk_vals,
        topk_idx=topk_idx,
    )


def _build_top_logprobs_lists(topk_vals, topk_idx, extend_seq_lens_list,
                              top_logprobs_nums):
    vals = jax.device_get(topk_vals).tolist()
    idx = jax.device_get(topk_idx).tolist()
    prefill_top_logprobs, decode_top_logprobs = [], []
    pt = 0
    for i, extend_seq_len in enumerate(extend_seq_lens_list):
        if extend_seq_len == 0:
            prefill_top_logprobs.append([])
            decode_top_logprobs.append([])
            continue
        k = top_logprobs_nums[i]
        rows_v = vals[pt:pt + extend_seq_len]
        rows_i = idx[pt:pt + extend_seq_len]
        prefill_top_logprobs.append(
            [list(zip(rows_v[j][:k], rows_i[j][:k]))
             for j in range(extend_seq_len - 1)])
        decode_top_logprobs.append(
            list(zip(rows_v[extend_seq_len - 1][:k],
                     rows_i[extend_seq_len - 1][:k])))
        pt += extend_seq_len
    return prefill_top_logprobs, decode_top_logprobs


def logits_processor_forward(input_ids, hidden_states, weight,
                             extend_seq_lens, extend_start_loc,
                             top_logprobs_nums, vocab_size,
                             final_logit_softcapping=None):
    """EXTEND (prefill) forward with return_logprob=True, tp_size == 1."""
    # TODO(synk): DECODE forward-mode branch and TP all-gather not implemented.
    return_top = any(x > 0 for x in top_logprobs_nums)
    kmax = min(max(top_logprobs_nums), vocab_size) if return_top else 0

    dev = _device_forward(input_ids, hidden_states, weight,
                          extend_seq_lens, extend_start_loc,
                          vocab_size=vocab_size,
                          final_logit_softcapping=final_logit_softcapping,
                          kmax=kmax)

    if return_top:
        prefill_top, decode_top = _build_top_logprobs_lists(
            dev["topk_vals"], dev["topk_idx"],
            jax.device_get(extend_seq_lens).tolist(), top_logprobs_nums)
    else:
        prefill_top = decode_top = None

    return dict(
        next_token_logits=dev["next_token_logits"],
        next_token_logprobs=dev["next_token_logprobs"],
        normalized_prompt_logprobs=dev["normalized_prompt_logprobs"],
        prefill_token_logprobs=dev["prefill_token_logprobs"],
        prefill_top_logprobs=prefill_top,
        decode_top_logprobs=decode_top,
    )


# ---------------------------------------------------------------------------
if __name__ == "__main__":
    # 2 sequences, 8 prompt tokens, hidden=32; weight has 256 rows but only
    # 200 are real vocab (56 TP-padding rows exercise the in-kernel mask).
    key = jax.random.PRNGKey(0)
    k1, k2, k3 = jax.random.split(key, 3)

    num_tokens, hidden = 8, 32
    weight_rows, vocab_size = 256, 200

    hidden_states_f32 = jax.random.normal(k1, (num_tokens, hidden), jnp.float32)
    weight_f32 = jax.random.normal(k2, (weight_rows, hidden), jnp.float32) * 0.05
    input_ids = jax.random.randint(k3, (num_tokens,), 0, vocab_size, jnp.int32)

    # bf16 matmul inputs (f32 accumulation inside the kernel)
    hidden_states = hidden_states_f32.astype(jnp.bfloat16)
    weight = weight_f32.astype(jnp.bfloat16)

    extend_seq_lens = jnp.array([5, 3], dtype=jnp.int32)
    extend_start_loc = jnp.array([0, 5], dtype=jnp.int32)
    top_logprobs_nums = [2, 3]
    final_logit_softcapping = 30.0  # exercises the tanh softcap path

    out = logits_processor_forward(
        input_ids, hidden_states, weight,
        extend_seq_lens, extend_start_loc,
        top_logprobs_nums, vocab_size=vocab_size,
        final_logit_softcapping=final_logit_softcapping)

    jax.block_until_ready(out["next_token_logits"])
    jax.block_until_ready(out["next_token_logprobs"])
    jax.block_until_ready(out["normalized_prompt_logprobs"])
    jax.block_until_ready(out["prefill_token_logprobs"])

    # --- sanity checks vs. pure-JAX reference on the same bf16 inputs ---
    xf = hidden_states.astype(jnp.float32)
    wf = weight.astype(jnp.float32)[:vocab_size]
    ref_logits = xf @ wf.T
    ref_logprobs = jax.nn.log_softmax(ref_logits, axis=-1)
    last_index = jnp.cumsum(extend_seq_lens) - 1

    np.testing.assert_allclose(np.asarray(out["next_token_logprobs"]),
                               np.asarray(ref_logprobs[last_index]),
                               atol=2e-3, rtol=2e-3)
    cap = final_logit_softcapping
    ref_last = cap * jnp.tanh(ref_logits[last_index] / cap)
    np.testing.assert_allclose(np.asarray(out["next_token_logits"]),
                               np.asarray(ref_last), atol=2e-3, rtol=2e-3)

    shifted = jnp.concatenate([input_ids[1:], jnp.zeros((1,), input_ids.dtype)])
    ref_ptl = ref_logprobs[jnp.arange(num_tokens), shifted]
    np.testing.assert_allclose(np.asarray(out["prefill_token_logprobs"]),
                               np.asarray(ref_ptl), atol=2e-3, rtol=2e-3)

    ref_norm = _get_normalized_prompt_logprobs(jnp.asarray(ref_ptl),
                                               extend_start_loc,
                                               extend_seq_lens)
    np.testing.assert_allclose(np.asarray(out["normalized_prompt_logprobs"]),
                               np.asarray(ref_norm), atol=2e-3, rtol=2e-3)

    # decode top-k logprob values per sequence
    lens = jax.device_get(extend_seq_lens).tolist()
    for i in range(len(lens)):
        k = top_logprobs_nums[i]
        got = np.array([v for v, _ in out["decode_top_logprobs"][i]])
        want = np.sort(np.asarray(ref_logprobs[last_index[i]]))[::-1][:k]
        np.testing.assert_allclose(got, want, atol=2e-3, rtol=2e-3)

    print("KERNEL_OK")
</pallas_src>

<mosaic_0001>
module attributes {stable_mosaic.version = 11 : i64} {
  func.func @_matmul_lse_kernel(%arg0: i32, %arg1: i32, %arg2: memref<8x32xbf16, #tpu.memory_space<vmem>>, %arg3: memref<256x32xbf16, #tpu.memory_space<vmem>>, %arg4: memref<8x256xf32, #tpu.memory_space<vmem>>, %arg5: memref<8x1xf32, #tpu.memory_space<vmem>>, %arg6: memref<8x1xf32, #tpu.memory_space<vmem>>, %arg7: memref<8x1xf32, #tpu.memory_space<vmem>>) attributes {dimension_semantics = [#tpu.dimension_semantics<parallel>, #tpu.dimension_semantics<arbitrary>], iteration_bounds = array<i64: 1, 1>, scalar_prefetch = 0 : i64, scratch_operands = 2 : i64, tpu.core_type = #tpu.core_type<tc>, window_params = [{transform_indices = @transform_0, window_bounds = array<i64: 8, 32>}, {transform_indices = @transform_1, window_bounds = array<i64: 256, 32>}, {transform_indices = @transform_2, window_bounds = array<i64: 8, 256>}, {transform_indices = @transform_3, window_bounds = array<i64: 8, 1>}]} {
    %c0_i32 = arith.constant 0 : i32
    %0 = arith.cmpi eq, %arg1, %c0_i32 : i32
    %1 = arith.extui %0 : i1 to i32
    %c0_i32_0 = arith.constant 0 : i32
    %2 = arith.cmpi ne, %1, %c0_i32_0 : i32
    scf.if %2 {
      %cst_19 = arith.constant 0xFF800000 : f32
      %34 = vector.broadcast %cst_19 : f32 to vector<8x1xf32>
      %c0_20 = arith.constant 0 : index
      %c0_21 = arith.constant 0 : index
      %35 = vector.load %arg6[%c0_20, %c0_21] : memref<8x1xf32, #tpu.memory_space<vmem>>, vector<8x1xf32>
      tpu.vector_store %arg6[%c0_20, %c0_21], %34 {strides = array<i32>} : memref<8x1xf32, #tpu.memory_space<vmem>>, vector<8x1xf32>,
      %cst_22 = arith.constant 0.000000e+00 : f32
      %36 = vector.broadcast %cst_22 : f32 to vector<8x1xf32>
      %c0_23 = arith.constant 0 : index
      %c0_24 = arith.constant 0 : index
      %37 = vector.load %arg7[%c0_23, %c0_24] : memref<8x1xf32, #tpu.memory_space<vmem>>, vector<8x1xf32>
      tpu.vector_store %arg7[%c0_23, %c0_24], %36 {strides = array<i32>} : memref<8x1xf32, #tpu.memory_space<vmem>>, vector<8x1xf32>,
    } else {
    }
    %c0 = arith.constant 0 : index
    %c0_1 = arith.constant 0 : index
    %3 = vector.load %arg2[%c0, %c0_1] : memref<8x32xbf16, #tpu.memory_space<vmem>>, vector<8x32xbf16>
    %c0_2 = arith.constant 0 : index
    %c0_3 = arith.constant 0 : index
    %4 = vector.load %arg3[%c0_2, %c0_3] : memref<256x32xbf16, #tpu.memory_space<vmem>>, vector<256x32xbf16>
    %cst = arith.constant dense<0.000000e+00> : vector<8x256xf32>
    %5 = tpu.matmul %3, %4, %cst {dimension_numbers = #tpu.dot_dimension_numbers<[1], [1], [0], [0], [0, 0, 1, 0], [], []>} : vector<8x32xbf16>, vector<256x32xbf16>, vector<8x256xf32> -> vector<8x256xf32>
    %6 = tpu.iota {dimensions = array<i32: 1>} : vector<8x256xi32>
    %c256_i32 = arith.constant 256 : i32
    %7 = arith.muli %arg1, %c256_i32 : i32
    %8 = vector.broadcast %7 : i32 to vector<8x256xi32>
    %9 = arith.addi %6, %8 : vector<8x256xi32>
    %c200_i32 = arith.constant 200 : i32
    %10 = vector.broadcast %c200_i32 : i32 to vector<8x256xi32>
    %11 = arith.cmpi slt, %9, %10 : vector<8x256xi32>
    %cst_4 = arith.constant 0xFF800000 : f32
    %12 = vector.broadcast %cst_4 : f32 to vector<8x256xf32>
    %13 = arith.select %11, %5, %12 : vector<8x256xi1>, vector<8x256xf32>
    %c0_5 = arith.constant 0 : index
    %c0_6 = arith.constant 0 : index
    %14 = vector.load %arg4[%c0_5, %c0_6] : memref<8x256xf32, #tpu.memory_space<vmem>>, vector<8x256xf32>
    tpu.vector_store %arg4[%c0_5, %c0_6], %13 {strides = array<i32>} : memref<8x256xf32, #tpu.memory_space<vmem>>, vector<8x256xf32>,
    %c0_7 = arith.constant 0 : index
    %c0_8 = arith.constant 0 : index
    %15 = vector.load %arg6[%c0_7, %c0_8] : memref<8x1xf32, #tpu.memory_space<vmem>>, vector<8x1xf32>
    %cst_9 = arith.constant dense<0xFF800000> : vector<8xf32>
    %16 = vector.multi_reduction <maximumf>, %13, %cst_9 [1] : vector<8x256xf32> to vector<8xf32>
    %17 = vector.shape_cast %16 : vector<8xf32> to vector<8x1xf32>
    %18 = arith.maximumf %15, %17 : vector<8x1xf32>
    %c0_10 = arith.constant 0 : index
    %c0_11 = arith.constant 0 : index
    %19 = vector.load %arg7[%c0_10, %c0_11] : memref<8x1xf32, #tpu.memory_space<vmem>>, vector<8x1xf32>
    %20 = arith.subf %15, %18 : vector<8x1xf32>
    %21 = math.exp %20 : vector<8x1xf32>
    %22 = arith.mulf %19, %21 : vector<8x1xf32>
    %23 = vector.broadcast %18 : vector<8x1xf32> to vector<8x256xf32>
    %24 = arith.subf %13, %23 : vector<8x256xf32>
    %25 = math.exp %24 : vector<8x256xf32>
    %cst_12 = arith.constant dense<0.000000e+00> : vector<8xf32>
    %26 = vector.multi_reduction <add>, %25, %cst_12 [1] : vector<8x256xf32> to vector<8xf32>
    %27 = vector.shape_cast %26 : vector<8xf32> to vector<8x1xf32>
    %28 = arith.addf %22, %27 : vector<8x1xf32>
    %c0_13 = arith.constant 0 : index
    %c0_14 = arith.constant 0 : index
    %29 = vector.load %arg7[%c0_13, %c0_14] : memref<8x1xf32, #tpu.memory_space<vmem>>, vector<8x1xf32>
    tpu.vector_store %arg7[%c0_13, %c0_14], %28 {strides = array<i32>} : memref<8x1xf32, #tpu.memory_space<vmem>>, vector<8x1xf32>,
    %c0_15 = arith.constant 0 : index
    %c0_16 = arith.constant 0 : index
    %30 = vector.load %arg6[%c0_15, %c0_16] : memref<8x1xf32, #tpu.memory_space<vmem>>, vector<8x1xf32>
    tpu.vector_store %arg6[%c0_15, %c0_16], %18 {strides = array<i32>} : memref<8x1xf32, #tpu.memory_space<vmem>>, vector<8x1xf32>,
    %c0_i32_17 = arith.constant 0 : i32
    %31 = arith.cmpi eq, %arg1, %c0_i32_17 : i32
    %32 = arith.extui %31 : i1 to i32
    %c0_i32_18 = arith.constant 0 : i32
    %33 = arith.cmpi ne, %32, %c0_i32_18 : i32
    scf.if %33 {
      %c0_19 = arith.constant 0 : index
      %c0_20 = arith.constant 0 : index
      %34 = vector.load %arg6[%c0_19, %c0_20] : memref<8x1xf32, #tpu.memory_space<vmem>>, vector<8x1xf32>
      %c0_21 = arith.constant 0 : index
      %c0_22 = arith.constant 0 : index
      %35 = vector.load %arg7[%c0_21, %c0_22] : memref<8x1xf32, #tpu.memory_space<vmem>>, vector<8x1xf32>
      %36 = math.log %35 : vector<8x1xf32>
      %37 = arith.addf %34, %36 : vector<8x1xf32>
      %c0_23 = arith.constant 0 : index
      %c0_24 = arith.constant 0 : index
      %38 = vector.load %arg5[%c0_23, %c0_24] : memref<8x1xf32, #tpu.memory_space<vmem>>, vector<8x1xf32>
      tpu.vector_store %arg5[%c0_23, %c0_24], %37 {strides = array<i32>} : memref<8x1xf32, #tpu.memory_space<vmem>>, vector<8x1xf32>,
    } else {
    }
    return
  }
  func.func @transform_0(%arg0: i32, %arg1: i32) -> (i32, i32) {
    %c0_i32 = arith.constant 0 : i32
    %c0_i32_0 = arith.constant 0 : i32
    return %arg0, %c0_i32 : i32, i32
  }
  func.func @transform_1(%arg0: i32, %arg1: i32) -> (i32, i32) {
    %c0_i32 = arith.constant 0 : i32
    %c0_i32_0 = arith.constant 0 : i32
    return %arg1, %c0_i32 : i32, i32
  }
  func.func @transform_2(%arg0: i32, %arg1: i32) -> (i32, i32) {
    %c0_i32 = arith.constant 0 : i32
    return %arg0, %arg1 : i32, i32
  }
  func.func @transform_3(%arg0: i32, %arg1: i32) -> (i32, i32) {
    %c0_i32 = arith.constant 0 : i32
    %c0_i32_0 = arith.constant 0 : i32
    return %arg0, %c0_i32 : i32, i32
  }
}

</mosaic_0001>

<bundles_post_ra>
// kernel: custom-call
= control target key start
LH: loop header
LB: loop body
LE: loop exit
PB: predicated region body
PF: predicated region fallthrough
CT: control target
= control target key end

     0   :  { %v1232_v0 = vmov 2147483648   ;;  %v1233_v1 = vmov 2147483647   ;;  %s1385_s0 = inlined_call_operand.vmem [shape: f32[8,256], index: 0, kind: input, shape index: {}]   ;;  %s1386_s1 = inlined_call_operand.vmem [shape: f32[8,3], index: 1, kind: output, shape index: {0}]   ;;  %s1387_s2 = inlined_call_operand.vmem [shape: s32[8,3], index: 2, kind: output, shape index: {1}]  }
   0x1   :  { %6 = vst [vmem:[#allocation9] sm:$0xff] %v1232_v0  ;;  %7 = vst [vmem:[#allocation11] sm:$0xff] %v1233_v1 }
   0x2   :  { %v33_v2 = vlaneseq  ;;  %v24_v3 = vld [vmem:[%s1385_s0] sm:$0xff]  ;;  %v1234_v4 = vmov 2147483648   ;;  %v1235_v5 = vmov 2147483647   ;;  %v26_v7 = vld [vmem:[%s1385_s0 + $0x8] sm:$0xff]  ;;  %s1267_s0 = smov 0  }
   0x3   :  { %74 = vst [vmem:[#allocation10] sm:$0xff] %v1234_v4  ;;  %75 = vst [vmem:[#allocation12] sm:$0xff] %v1235_v5  ;;  %v44_v10 = vsub.s32 2147483647, %v24_v3  ;;  %vm43_vm0 = vcmp.lt.s32.totalorder %v24_v3, 0  ;;  %vm52_vm1 = vcmp.lt.s32.totalorder %v26_v7, 0 }
   0x4   :  { %v1260_v6 = vshrl.u32 %v33_v2, 7  ;;  %v34_v8 = vand.u32 127, %v33_v2  ;;  %v53_v12 = vsub.s32 2147483647, %v26_v7 }
   0x5   :  { %v45_v14 = vsel %vm43_vm0, %v44_v10, %v24_v3 }
   0x6   :  { %v37_v9 = vshrl.u32 %v1260_v6, 3  ;;  %v54_v15 = vsel %vm52_vm1, %v53_v12, %v26_v7 }
   0x8   :  { %v39_v11 = vmul.u32 128, %v37_v9 }
   0xa   :  { %v40_v13 = vadd.s32 %v39_v11, %v34_v8 }
   0xc   :  { %vm47_vm2 = vcmp.lt.s32.totalorder %v40_v13, 256  ;;  %v55_v16 = vadd.s32 128, %v40_v13  ;;  %69 = vst [vmem:[#allocation14] sm:$0xff] %v40_v13 }
   0xd   :  { %v48_v17 = vsel %vm47_vm2, %v45_v14, 2147483648 }
   0xe   :  { %49 = vst [vmem:[#allocation13] sm:$0xff] %v48_v17  ;;  %vm56_vm3 = vcmp.lt.s32.totalorder %v55_v16, 256  ;;  %72 = vst [vmem:[#allocation14 + $0x8] sm:$0xff] %v55_v16 }
   0xf   :  { %v57_v18 = vsel %vm56_vm3, %v54_v15, 2147483648 }
  0x10   :  { %58 = vst [vmem:[#allocation13 + $0x8] sm:$0xff] %v57_v18 }
  0x11 LB: > { %s376_s13 = scalar_lea.vmem [#allocation10], %s1230_s0  ;;  %s378_s14 = scalar_lea.vmem [#allocation12], %s1230_s0  ;;  %s1230_s0 = sphi %s1267_s0, %s82_s0  }
  0x12   : > { %s82_s0 = sadd.s32 1, %s1230_s0  }
  0x13   : > { %v84_v20 = vld [vmem:[#allocation14] sm:$0xff]  ;;  %p79_p8 = scmp.ge.s32.totalorder %s82_s0, 3  }
  0x15   : > { %v83_v19 = vld [vmem:[#allocation13] sm:$0xff]  ;;  %v89_v22 = vld [vmem:[#allocation14 + $0x8] sm:$0xff] }
  0x16   : > { %vm93_vm6 = vcmp.lt.s32.totalorder %v89_v22, %v84_v20 }
  0x17   : > { %v87_v21 = vld [vmem:[#allocation13 + $0x8] sm:$0xff] }
  0x18   : > { %vm91_vm4 = vcmp.gt.s32.totalorder %v87_v21, %v83_v19  ;;  %vm92_vm5 = vcmp.eq.s32.totalorder %v87_v21, %v83_v19 }
  0x19   : > { %vm94_vm7 = vmand %vm92_vm5, %vm93_vm6 }
  0x1a   : > { %vm95_vm8 = vmor %vm91_vm4, %vm94_vm7 }
  0x1b   : > { %v97_v23 = vsel %vm95_vm8, %v89_v22, %v84_v20  ;;  %v96_v24 = vsel %vm95_vm8, %v87_v21, %v83_v19 }
  0x1c   : > { %131 = vxpose.xlu1.b32.start [1/16] %v97_v23, 128  ;;  %99 = vxpose.xlu0.b32.start [1/16] %v96_v24, 128 }
  0x20   : > { %132 = vxpose.xlu1.b32.cont [2/16] %v97_v23, 128  ;;  %100 = vxpose.xlu0.b32.cont [2/16] %v96_v24, 128 }
  0x24   : > { %133 = vxpose.xlu1.b32.cont [3/16] %v97_v23, 128  ;;  %101 = vxpose.xlu0.b32.cont [3/16] %v96_v24, 128 }
  0x28   : > { %134 = vxpose.xlu1.b32.cont [4/16] %v97_v23, 128  ;;  %102 = vxpose.xlu0.b32.cont [4/16] %v96_v24, 128 }
  0x2c   : > { %135 = vxpose.xlu1.b32.cont [5/16] %v97_v23, 128  ;;  %103 = vxpose.xlu0.b32.cont [5/16] %v96_v24, 128 }
  0x30   : > { %136 = vxpose.xlu1.b32.cont [6/16] %v97_v23, 128  ;;  %104 = vxpose.xlu0.b32.cont [6/16] %v96_v24, 128 }
  0x34   : > { %137 = vxpose.xlu1.b32.cont [7/16] %v97_v23, 128  ;;  %105 = vxpose.xlu0.b32.cont [7/16] %v96_v24, 128 }
  0x38   : > { %138 = vxpose.xlu1.b32.cont [8/16] %v97_v23, 128  ;;  %106 = vxpose.xlu0.b32.cont [8/16] %v96_v24, 128 }
  0x3c   : > { %139 = vxpose.xlu1.b32.cont [9/16] %v97_v23, 128  ;;  %107 = vxpose.xlu0.b32.cont [9/16] %v96_v24, 128 }
  0x40   : > { %140 = vxpose.xlu1.b32.cont [10/16] %v97_v23, 128  ;;  %108 = vxpose.xlu0.b32.cont [10/16] %v96_v24, 128 }
  0x44   : > { %141 = vxpose.xlu1.b32.cont [11/16] %v97_v23, 128  ;;  %109 = vxpose.xlu0.b32.cont [11/16] %v96_v24, 128 }
  0x48   : > { %142 = vxpose.xlu1.b32.cont [12/16] %v97_v23, 128  ;;  %110 = vxpose.xlu0.b32.cont [12/16] %v96_v24, 128 }
  0x4c   : > { %143 = vxpose.xlu1.b32.cont [13/16] %v97_v23, 128  ;;  %111 = vxpose.xlu0.b32.cont [13/16] %v96_v24, 128 }
  0x50   : > { %144 = vxpose.xlu1.b32.cont [14/16] %v97_v23, 128  ;;  %112 = vxpose.xlu0.b32.cont [14/16] %v96_v24, 128 }
  0x54   : > { %145 = vxpose.xlu1.b32.cont [15/16] %v97_v23, 128  ;;  %113 = vxpose.xlu0.b32.cont [15/16] %v96_v24, 128 }
  0x58   : > { %146 = vxpose.xlu1.b32.end [16/16] %v97_v23, 128  ;;  %114 = vxpose.xlu0.b32.end [16/16] %v96_v24, 128 }
  0x9c   : > { %v147_v25 = vpop.trf.xlu1  ;;  %v115_v26 = vpop.trf.xlu0 }
  0xa0   : > { %v148_v27 = vpop.trf.xlu1  ;;  %v116_v28 = vpop.trf.xlu0 }
  0xa1   : > { %vm167_vm9 = vcmp.lt.s32.totalorder %v148_v27, %v147_v25  ;;  %vm165_vm10 = vcmp.gt.s32.totalorder %v116_v28, %v115_v26  ;;  %vm166_vm11 = vcmp.eq.s32.totalorder %v116_v28, %v115_v26 }
  0xa2   : > { %vm168_vm12 = vmand %vm166_vm11, %vm167_vm9 }
  0xa3   : > { %vm169_vm13 = vmor %vm165_vm10, %vm168_vm12 }
  0xa4   : > { %v170_v29 = vsel %vm169_vm13, %v116_v28, %v115_v26  ;;  %v149_v30 = vpop.trf.xlu1  ;;  %v171_v31 = vsel %vm169_vm13, %v148_v27, %v147_v25  ;;  %v117_v32 = vpop.trf.xlu0 }
  0xa5   : > { %vm176_vm14 = vcmp.lt.s32.totalorder %v149_v30, %v171_v31  ;;  %vm174_vm15 = vcmp.gt.s32.totalorder %v117_v32, %v170_v29  ;;  %vm175_vm0 = vcmp.eq.s32.totalorder %v117_v32, %v170_v29 }
  0xa6   : > { %vm177_vm1 = vmand %vm175_vm0, %vm176_vm14 }
  0xa7   : > { %vm178_vm2 = vmor %vm174_vm15, %vm177_vm1 }
  0xa8   : > { %v179_v33 = vsel %vm178_vm2, %v117_v32, %v170_v29  ;;  %v150_v34 = vpop.trf.xlu1  ;;  %v180_v35 = vsel %vm178_vm2, %v149_v30, %v171_v31  ;;  %v118_v36 = vpop.trf.xlu0 }
  0xa9   : > { %vm185_vm3 = vcmp.lt.s32.totalorder %v150_v34, %v180_v35  ;;  %vm183_vm4 = vcmp.gt.s32.totalorder %v118_v36, %v179_v33  ;;  %vm184_vm5 = vcmp.eq.s32.totalorder %v118_v36, %v179_v33 }
  0xaa   : > { %vm186_vm6 = vmand %vm184_vm5, %vm185_vm3 }
  0xab   : > { %vm187_vm7 = vmor %vm183_vm4, %vm186_vm6 }
  0xac   : > { %v188_v37 = vsel %vm187_vm7, %v118_v36, %v179_v33  ;;  %v151_v38 = vpop.trf.xlu1  ;;  %v189_v39 = vsel %vm187_vm7, %v150_v34, %v180_v35  ;;  %v119_v40 = vpop.trf.xlu0 }
  0xad   : > { %vm194_vm8 = vcmp.lt.s32.totalorder %v151_v38, %v189_v39  ;;  %vm192_vm9 = vcmp.gt.s32.totalorder %v119_v40, %v188_v37  ;;  %vm193_vm10 = vcmp.eq.s32.totalorder %v119_v40, %v188_v37 }
  0xae   : > { %vm195_vm11 = vmand %vm193_vm10, %vm194_vm8 }
  0xaf   : > { %vm196_vm12 = vmor %vm192_vm9, %vm195_vm11 }
  0xb0   : > { %v197_v41 = vsel %vm196_vm12, %v119_v40, %v188_v37  ;;  %v152_v42 = vpop.trf.xlu1  ;;  %v198_v43 = vsel %vm196_vm12, %v151_v38, %v189_v39  ;;  %v120_v44 = vpop.trf.xlu0 }
  0xb1   : > { %vm203_vm13 = vcmp.lt.s32.totalorder %v152_v42, %v198_v43  ;;  %vm201_vm14 = vcmp.gt.s32.totalorder %v120_v44, %v197_v41  ;;  %vm202_vm15 = vcmp.eq.s32.totalorder %v120_v44, %v197_v41 }
  0xb2   : > { %vm204_vm0 = vmand %vm202_vm15, %vm203_vm13 }
  0xb3   : > { %vm205_vm1 = vmor %vm201_vm14, %vm204_vm0 }
  0xb4   : > { %v206_v45 = vsel %vm205_vm1, %v120_v44, %v197_v41  ;;  %v153_v46 = vpop.trf.xlu1  ;;  %v207_v47 = vsel %vm205_vm1, %v152_v42, %v198_v43  ;;  %v121_v48 = vpop.trf.xlu0 }
  0xb5   : > { %vm212_vm2 = vcmp.lt.s32.totalorder %v153_v46, %v207_v47  ;;  %vm210_vm3 = vcmp.gt.s32.totalorder %v121_v48, %v206_v45  ;;  %vm211_vm4 = vcmp.eq.s32.totalorder %v121_v48, %v206_v45 }
  0xb6   : > { %vm213_vm5 = vmand %vm211_vm4, %vm212_vm2 }
  0xb7   : > { %vm214_vm6 = vmor %vm210_vm3, %vm213_vm5 }
  0xb8   : > { %v215_v49 = vsel %vm214_vm6, %v121_v48, %v206_v45  ;;  %v154_v50 = vpop.trf.xlu1  ;;  %v216_v51 = vsel %vm214_vm6, %v153_v46, %v207_v47  ;;  %v122_v52 = vpop.trf.xlu0 }
  0xb9   : > { %vm221_vm7 = vcmp.lt.s32.totalorder %v154_v50, %v216_v51  ;;  %vm219_vm8 = vcmp.gt.s32.totalorder %v122_v52, %v215_v49  ;;  %vm220_vm9 = vcmp.eq.s32.totalorder %v122_v52, %v215_v49 }
  0xba   : > { %vm222_vm10 = vmand %vm220_vm9, %vm221_vm7 }
  0xbb   : > { %vm223_vm11 = vmor %vm219_vm8, %vm222_vm10 }
  0xbc   : > { %v224_v53 = vsel %vm223_vm11, %v122_v52, %v215_v49  ;;  %v155_v54 = vpop.trf.xlu1  ;;  %v225_v55 = vsel %vm223_vm11, %v154_v50, %v216_v51  ;;  %v123_v56 = vpop.trf.xlu0 }
  0xbd   : > { %vm230_vm12 = vcmp.lt.s32.totalorder %v155_v54, %v225_v55  ;;  %vm228_vm13 = vcmp.gt.s32.totalorder %v123_v56, %v224_v53  ;;  %vm229_vm14 = vcmp.eq.s32.totalorder %v123_v56, %v224_v53 }
  0xbe   : > { %vm231_vm15 = vmand %vm229_vm14, %vm230_vm12 }
  0xbf   : > { %vm232_vm0 = vmor %vm228_vm13, %vm231_vm15 }
  0xc0   : > { %v233_v57 = vsel %vm232_vm0, %v123_v56, %v224_v53  ;;  %v156_v58 = vpop.trf.xlu1  ;;  %v234_v59 = vsel %vm232_vm0, %v155_v54, %v225_v55  ;;  %v124_v60 = vpop.trf.xlu0 }
  0xc1   : > { %vm239_vm1 = vcmp.lt.s32.totalorder %v156_v58, %v234_v59  ;;  %vm237_vm2 = vcmp.gt.s32.totalorder %v124_v60, %v233_v57  ;;  %vm238_vm3 = vcmp.eq.s32.totalorder %v124_v60, %v233_v57 }
  0xc2   : > { %vm240_vm4 = vmand %vm238_vm3, %vm239_vm1 }
  0xc3   : > { %vm241_vm5 = vmor %vm237_vm2, %vm240_vm4 }
  0xc4   : > { %v242_v61 = vsel %vm241_vm5, %v124_v60, %v233_v57  ;;  %v157_v62 = vpop.trf.xlu1  ;;  %v243_v63 = vsel %vm241_vm5, %v156_v58, %v234_v59  ;;  %v125_v0 = vpop.trf.xlu0 }
  0xc5   : > { %vm248_vm6 = vcmp.lt.s32.totalorder %v157_v62, %v243_v63  ;;  %vm246_vm7 = vcmp.gt.s32.totalorder %v125_v0, %v242_v61  ;;  %vm247_vm8 = vcmp.eq.s32.totalorder %v125_v0, %v242_v61 }
  0xc6   : > { %vm249_vm9 = vmand %vm247_vm8, %vm248_vm6 }
  0xc7   : > { %vm250_vm10 = vmor %vm246_vm7, %vm249_vm9 }
  0xc8   : > { %v251_v1 = vsel %vm250_vm10, %v125_v0, %v242_v61  ;;  %v158_v3 = vpop.trf.xlu1  ;;  %v252_v4 = vsel %vm250_vm10, %v157_v62, %v243_v63  ;;  %v126_v5 = vpop.trf.xlu0  ;;  %v1236_v62 = vmov 2147483648   ;;  %v1237_v63 = vmov 2147483647  }
  0xc9   : > { %vm257_vm11 = vcmp.lt.s32.totalorder %v158_v3, %v252_v4  ;;  %vm255_vm12 = vcmp.gt.s32.totalorder %v126_v5, %v251_v1  ;;  %vm256_vm13 = vcmp.eq.s32.totalorder %v126_v5, %v251_v1 }
  0xca   : > { %vm258_vm14 = vmand %vm256_vm13, %vm257_vm11 }
  0xcb   : > { %vm259_vm15 = vmor %vm255_vm12, %vm258_vm14 }
  0xcc   : > { %v260_v7 = vsel %vm259_vm15, %v126_v5, %v251_v1  ;;  %v159_v8 = vpop.trf.xlu1  ;;  %v261_v9 = vsel %vm259_vm15, %v158_v3, %v252_v4  ;;  %v127_v10 = vpop.trf.xlu0 }
  0xcd   : > { %vm266_vm0 = vcmp.lt.s32.totalorder %v159_v8, %v261_v9  ;;  %vm264_vm1 = vcmp.gt.s32.totalorder %v127_v10, %v260_v7  ;;  %vm265_vm2 = vcmp.eq.s32.totalorder %v127_v10, %v260_v7 }
  0xce   : > { %vm267_vm3 = vmand %vm265_vm2, %vm266_vm0 }
  0xcf   : > { %vm268_vm4 = vmor %vm264_vm1, %vm267_vm3 }
  0xd0   : > { %v269_v11 = vsel %vm268_vm4, %v127_v10, %v260_v7  ;;  %v160_v12 = vpop.trf.xlu1  ;;  %v270_v13 = vsel %vm268_vm4, %v159_v8, %v261_v9  ;;  %v128_v14 = vpop.trf.xlu0 }
  0xd1   : > { %vm275_vm5 = vcmp.lt.s32.totalorder %v160_v12, %v270_v13  ;;  %vm273_vm6 = vcmp.gt.s32.totalorder %v128_v14, %v269_v11  ;;  %vm274_vm7 = vcmp.eq.s32.totalorder %v128_v14, %v269_v11 }
  0xd2   : > { %vm276_vm8 = vmand %vm274_vm7, %vm275_vm5 }
  0xd3   : > { %vm277_vm9 = vmor %vm273_vm6, %vm276_vm8 }
  0xd4   : > { %v278_v15 = vsel %vm277_vm9, %v128_v14, %v269_v11  ;;  %v161_v16 = vpop.trf.xlu1  ;;  %v279_v17 = vsel %vm277_vm9, %v160_v12, %v270_v13  ;;  %v129_v18 = vpop.trf.xlu0 }
  0xd5   : > { %vm284_vm10 = vcmp.lt.s32.totalorder %v161_v16, %v279_v17  ;;  %vm282_vm11 = vcmp.gt.s32.totalorder %v129_v18, %v278_v15  ;;  %vm283_vm12 = vcmp.eq.s32.totalorder %v129_v18, %v278_v15 }
  0xd6   : > { %vm285_vm13 = vmand %vm283_vm12, %vm284_vm10 }
  0xd7   : > { %vm286_vm14 = vmor %vm282_vm11, %vm285_vm13 }
  0xd8   : > { %v287_v19 = vsel %vm286_vm14, %v129_v18, %v278_v15  ;;  %v162_v20 = vpop.trf.xlu1  ;;  %v288_v21 = vsel %vm286_vm14, %v161_v16, %v279_v17  ;;  %v130_v22 = vpop.trf.xlu0  ;;  %v618_v18 = vld [vmem:[#allocation9] sm:$0xff] (%p79_p8) }
  0xd9   : > { %vm293_vm15 = vcmp.lt.s32.totalorder %v162_v20, %v288_v21  ;;  %vm291_vm0 = vcmp.gt.s32.totalorder %v130_v22, %v287_v19  ;;  %vm292_vm1 = vcmp.eq.s32.totalorder %v130_v22, %v287_v19 }
  0xda   : > { %vm294_vm2 = vmand %vm292_vm1, %vm293_vm15 }
  0xdb   : > { %vm295_vm3 = vmor %vm291_vm0, %vm294_vm2 }
  0xdc   : > { %v296_v23 = vsel %vm295_vm3, %v130_v22, %v287_v19  ;;  %v297_v24 = vsel %vm295_vm3, %v162_v20, %v288_v21  ;;  %v619_v19 = vld [vmem:[#allocation11] sm:$0xff] (%p79_p8)  ;;  %v1238_v20 = vmov (%p79_p8), 839939668   ;;  %v1239_v22 = vmov (%p79_p8), 1417023538  }
  0xdd   : > { %v299_v25 = vrot.slane %v296_v23, 1  ;;  %v300_v26 = vrot.slane %v297_v24, 1  ;;  %v643_v21 = vunpack.c.l.s4 (%p79_p8), %v1238_v20 }
  0xdf   : > { %vm302_vm4 = vcmp.gt.s32.totalorder %v299_v25, %v296_v23  ;;  %vm303_vm5 = vcmp.eq.s32.totalorder %v299_v25, %v296_v23  ;;  %vm304_vm6 = vcmp.lt.s32.totalorder %v300_v26, %v297_v24 }
  0xe0   : > { %vm305_vm7 = vmand %vm303_vm5, %vm304_vm6 }
  0xe1   : > { %vm306_vm8 = vmor %vm302_vm4, %vm305_vm7 }
  0xe2   : > { %v307_v27 = vsel %vm306_vm8, %v299_v25, %v296_v23  ;;  %v308_v28 = vsel %vm306_vm8, %v300_v26, %v297_v24  ;;  %v671_v23 = vunpack.c.l.s4 (%p79_p8), %v1239_v22  ;;  %v644_v24 = vunpack.c.0.s8 (%p79_p8), %v643_v21 }
  0xe3   : > { %v310_v29 = vrot.slane %v307_v27, 1  ;;  %v311_v30 = vrot.slane %v308_v28, 1 }
  0xe5   : > { %vm313_vm9 = vcmp.gt.s32.totalorder %v310_v29, %v307_v27  ;;  %vm314_vm10 = vcmp.eq.s32.totalorder %v310_v29, %v307_v27  ;;  %vm315_vm11 = vcmp.lt.s32.totalorder %v311_v30, %v308_v28 }
  0xe6   : > { %vm316_vm12 = vmand %vm314_vm10, %vm315_vm11 }
  0xe7   : > { %vm317_vm13 = vmor %vm313_vm9, %vm316_vm12 }
  0xe8   : > { %v318_v31 = vsel %vm317_vm13, %v310_v29, %v307_v27  ;;  %v319_v32 = vsel %vm317_vm13, %v311_v30, %v308_v28  ;;  %v664_v28 = vand.u32 (%p79_p8), 4, %v1260_v6  ;;  %v672_v30 = vunpack.c.0.s8 (%p79_p8), %v671_v23 }
  0xe9   : > { %v321_v33 = vrot.slane %v318_v31, 1  ;;  %v322_v34 = vrot.slane %v319_v32, 1 }
  0xeb   : > { %vm326_vm14 = vcmp.lt.s32.totalorder %v322_v34, %v319_v32  ;;  %vm324_vm15 = vcmp.gt.s32.totalorder %v321_v33, %v318_v31  ;;  %vm325_vm0 = vcmp.eq.s32.totalorder %v321_v33, %v318_v31 }
  0xec   : > { %vm327_vm1 = vmand %vm325_vm0, %vm326_vm14 }
  0xed   : > { %vm328_vm2 = vmor %vm324_vm15, %vm327_vm1 }
  0xee   : > { %v329_v35 = vsel %vm328_vm2, %v321_v33, %v318_v31  ;;  %v330_v36 = vsel %vm328_vm2, %v322_v34, %v319_v32 }
  0xef   : > { %v332_v37 = vrot.slane %v329_v35, 1  ;;  %v333_v38 = vrot.slane %v330_v36, 1 }
  0xf1   : > { %vm335_vm3 = vcmp.gt.s32.totalorder %v332_v37, %v329_v35  ;;  %vm336_vm4 = vcmp.eq.s32.totalorder %v332_v37, %v329_v35  ;;  %vm337_vm5 = vcmp.lt.s32.totalorder %v333_v38, %v330_v36 }
  0xf2   : > { %vm338_vm6 = vmand %vm336_vm4, %vm337_vm5 }
  0xf3   : > { %vm339_vm7 = vmor %vm335_vm3, %vm338_vm6 }
  0xf4   : > { %v340_v39 = vsel %vm339_vm7, %v332_v37, %v329_v35  ;;  %v341_v40 = vsel %vm339_vm7, %v333_v38, %v330_v36  ;;  %v1240_v36 = vmov (%p79_p8), 1732584193   ;;  %v1320_v38 = vsub.s32 (%p79_p8), %v672_v30, %v1260_v6 }
  0xf5   : > { %v343_v41 = vrot.slane %v340_v39, 1  ;;  %v344_v42 = vrot.slane %v341_v40, 1  ;;  %v699_v37 = vunpack.c.l.s4 (%p79_p8), %v1240_v36 }
  0xf7   : > { %vm346_vm8 = vcmp.gt.s32.totalorder %v343_v41, %v340_v39  ;;  %vm347_vm9 = vcmp.eq.s32.totalorder %v343_v41, %v340_v39  ;;  %vm348_vm10 = vcmp.lt.s32.totalorder %v344_v42, %v341_v40 }
  0xf8   : > { %vm349_vm11 = vmand %vm347_vm9, %vm348_vm10 }
  0xf9   : > { %vm350_vm12 = vmor %vm346_vm8, %vm349_vm11 }
  0xfa   : > { %v351_v43 = vsel %vm350_vm12, %v343_v41, %v340_v39  ;;  %v352_v44 = vsel %vm350_vm12, %v344_v42, %v341_v40  ;;  %v692_v39 = vand.u32 (%p79_p8), 2, %v1260_v6  ;;  %v700_v42 = vunpack.c.0.s8 (%p79_p8), %v699_v37 }
  0xfb   : > { %v354_v45 = vrot.slane %v351_v43, 1  ;;  %v355_v46 = vrot.slane %v352_v44, 1 }
  0xfd   : > { %vm357_vm13 = vcmp.gt.s32.totalorder %v354_v45, %v351_v43  ;;  %vm358_vm14 = vcmp.eq.s32.totalorder %v354_v45, %v351_v43  ;;  %vm359_vm15 = vcmp.lt.s32.totalorder %v355_v46, %v352_v44 }
  0xfe   : > { %vm360_vm0 = vmand %vm358_vm14, %vm359_vm15 }
  0xff   : > { %vm361_vm1 = vmor %vm357_vm13, %vm360_vm0 }
 0x100   : > { %v362_v47 = vsel %vm361_vm1, %v354_v45, %v351_v43  ;;  %v363_v48 = vsel %vm361_vm1, %v355_v46, %v352_v44 }
 0x101   : > { %v365_v49 = vrot.slane %v362_v47, 1  ;;  %v366_v50 = vrot.slane %v363_v48, 1 }
 0x103   : > { %vm368_vm2 = vcmp.gt.s32.totalorder %v365_v49, %v362_v47  ;;  %vm369_vm3 = vcmp.eq.s32.totalorder %v365_v49, %v362_v47  ;;  %vm370_vm4 = vcmp.lt.s32.totalorder %v366_v50, %v363_v48 }
 0x104   : > { %vm371_vm5 = vmand %vm369_vm3, %vm370_vm4  ;;  %vm1314_vm4 = vcmp.ne.s32.totalorder (%p79_p8), %v664_v28, 0 }
 0x105   : > { %vm372_vm6 = vmor %vm368_vm2, %vm371_vm5 }
 0x106   : > { %v374_v51 = vsel %vm372_vm6, %v366_v50, %v363_v48  ;;  %v373_v52 = vsel %vm372_vm6, %v365_v49, %v362_v47  ;;  %v1334_v47 = vsub.s32 (%p79_p8), %v700_v42, %v1260_v6 }
 0x107   : > { %381 = vxpose.xlu0.b32.start.end [1/1] (short) (narrow) %v374_v51, 8  ;;  %377 = vst [vmem:[%s376_s13] sm:$0x1] %v373_v52  ;;  %379 = vst [vmem:[%s378_s14] sm:$0x1] %v374_v51  ;;  %v720_v51 = vand.u32 (%p79_p8), 1, %v1260_v6 }
 0x10e   :  { %v606_v16 = vld [vmem:[#allocation10 + $0x7] ss:$-1 sm:$0xff] (%p79_p8)  ;;  %v612_v17 = vld [vmem:[#allocation12 + $0x7] ss:$-1 sm:$0xff] (%p79_p8) }
 0x10f   :  { %vm624_vm15 = vcmp.gt.s32.totalorder (%p79_p8), %v618_v18, %v606_v16  ;;  %vm625_vm0 = vcmp.eq.s32.totalorder (%p79_p8), %v618_v18, %v606_v16  ;;  %vm626_vm1 = vcmp.lt.s32.totalorder (%p79_p8), %v619_v19, %v612_v17 }
 0x110   :  { %vm627_vm2 = vmand (%p79_p8), %vm625_vm0, %vm626_vm1  ;;  %vm1327_vm0 = vcmp.ne.s32.totalorder (%p79_p8), %v692_v39, 0 }
 0x111   :  { %vm628_vm3 = vmor (%p79_p8), %vm624_vm15, %vm627_vm2 }
 0x112   :  { %v629_v25 = vsel (%p79_p8), %vm628_vm3, %v618_v18, %v606_v16  ;;  %v631_v26 = vsel (%p79_p8), %vm628_vm3, %v606_v16, %v618_v18  ;;  %v633_v27 = vsel (%p79_p8), %vm628_vm3, %v619_v19, %v612_v17  ;;  %v635_v29 = vsel (%p79_p8), %vm628_vm3, %v612_v17, %v619_v19 }
 0x187   : > { %v397_v53 = vpop.trf.xlu0 }
 0x188   : > { %v436_v54 = vrot.slane %v397_v53, 1  ;;  %1190 = vpush %v397_v53 }
 0x18a   : > { %1192 = vpush %v436_v54  ;;  %v460_v55 = vrot.slane %v436_v54, 1 }
 0x18c   : > { %1194 = vpush %v460_v55  ;;  %v484_v56 = vrot.slane %v460_v55, 1 }
 0x18e   : > { %1196 = vpush %v484_v56  ;;  %v508_v57 = vrot.slane %v484_v56, 1 }
 0x190   : > { %1198 = vpush %v508_v57  ;;  %v532_v58 = vrot.slane %v508_v57, 1 }
 0x192   : > { %1200 = vpush %v532_v58  ;;  %v556_v59 = vrot.slane %v532_v58, 1 }
 0x194   : > { %1202 = vpush %v556_v59  ;;  %v580_v60 = vrot.slane %v556_v59, 1 }
 0x196   : > { %1204 = vpush %v580_v60 }
 0x1b9   : > { %s1191_s15 = spop %1190 }
 0x1ba   : > { %s414_s16 = sshrl.u32 %s1191_s15, 7  ;;  %s416_s17 = ssub.s32 0, %s1191_s15 }
 0x1bb   : > { %s1160_s18 = sshll.u32 %s414_s16, 3  ;;  %p415_p0 = scmp.lt.s32.totalorder %s1191_s15, 0 }
 0x1bc   : > { %s1158_s19 = smin.u32 %s1191_s15, %s416_s17  ;;  %s1193_s22 = spop %1192 }
 0x1bd   : > { %s418_s20 = sand.u32 127, %s1158_s19   ;;  %s438_s23 = sshrl.u32 %s1193_s22, 7 }
 0x1be   : > { %s419_s21 = ssub.s32 0, %s418_s20  ;;  %s440_s27 = ssub.s32 0, %s1193_s22 }
 0x1bf   : > { %s1395_s21 = smov (!%p415_p0, %s419_s21), %s418_s20  ;;  %s1162_s29 = smin.u32 %s1193_s22, %s440_s27 }
 0x1c0   : > { %s421_s24 = sshrl.u32 %s1395_s21, 7  ;;  %s423_s25 = sand.u32 127, %s1395_s21  }
 0x1c1   : > { %s1159_s26 = sshll.u32 %s421_s24, 10  ;;  %p439_p1 = scmp.lt.s32.totalorder %s1193_s22, 0 }
 0x1c2   : > { %s424_s28 = sadd.s32 %s1159_s26, %s423_s25  ;;  %s442_s30 = sand.u32 127, %s1162_s29  }
 0x1c3   : > { %v426_v61 = vstv %s424_s28  ;;  %s443_s3 = ssub.s32 0, %s442_s30  ;;  %s1164_s4 = sshll.u32 %s438_s23, 3 }
 0x1c4   : > { %vm428_vm7 = vcmp.eq.s32.totalorder %v33_v2, %v426_v61  ;;  %s430_s5 = scalar_lea.vmem [#allocation13], %s1160_s18  ;;  %s433_s6 = scalar_lea.vmem [#allocation14], %s1160_s18 }
 0x1c5   : > { %431 = vst.msk [vmem:[%s430_s5] sm:$0xff] %vm428_vm7, %v1236_v62  ;;  %434 = vst.msk [vmem:[%s433_s6] sm:$0xff] %vm428_vm7, %v1237_v63  ;;  %s1397_s3 = smov (!%p439_p1, %s443_s3), %s442_s30  ;;  %s1195_s7 = spop %1194 }
 0x1c6   : > { %s445_s8 = sshrl.u32 %s1397_s3, 7  ;;  %s447_s9 = sand.u32 127, %s1397_s3  }
 0x1c7   : > { %s1163_s10 = sshll.u32 %s445_s8, 10  ;;  %s462_s12 = sshrl.u32 %s1195_s7, 7 }
 0x1c8   : > { %s448_s11 = sadd.s32 %s1163_s10, %s447_s9  ;;  %s464_s13 = ssub.s32 0, %s1195_s7 }
 0x1c9   : > { %v450_v0 = vstv %s448_s11  ;;  %p463_p2 = scmp.lt.s32.totalorder %s1195_s7, 0  ;;  %s1166_s14 = smin.u32 %s1195_s7, %s464_s13 }
 0x1ca   : > { %v451_v1 = vadd.s32 128, %v450_v0  ;;  %s466_s15 = sand.u32 127, %s1166_s14   ;;  %s1168_s16 = sshll.u32 %s462_s12, 3 }
 0x1cb   : > { %s467_s17 = ssub.s32 0, %s466_s15  ;;  %s1197_s18 = spop %1196 }
 0x1cc   : > { %vm452_vm8 = vcmp.eq.s32.totalorder %v33_v2, %v451_v1  ;;  %s454_s19 = scalar_lea.vmem [#allocation13], %s1164_s4  ;;  %s457_s20 = scalar_lea.vmem [#allocation14], %s1164_s4 }
 0x1cd   : > { %455 = vst.msk [vmem:[%s454_s19] sm:$0xff] %vm452_vm8, %v1236_v62  ;;  %458 = vst.msk [vmem:[%s457_s20] sm:$0xff] %vm452_vm8, %v1237_v63  ;;  %s1399_s17 = smov (!%p463_p2, %s467_s17), %s466_s15  ;;  %s486_s21 = sshrl.u32 %s1197_s18, 7 }
 0x1ce   : > { %s469_s22 = sshrl.u32 %s1399_s17, 7  ;;  %s471_s23 = sand.u32 127, %s1399_s17  }
 0x1cf   : > { %s1167_s24 = sshll.u32 %s469_s22, 10  ;;  %s488_s25 = ssub.s32 0, %s1197_s18 }
 0x1d0   : > { %s472_s26 = sadd.s32 %s1167_s24, %s471_s23  ;;  %s1170_s27 = smin.u32 %s1197_s18, %s488_s25 }
 0x1d1   : > { %v474_v3 = vstv %s472_s26  ;;  %p487_p3 = scmp.lt.s32.totalorder %s1197_s18, 0  ;;  %s490_s28 = sand.u32 127, %s1170_s27  }
 0x1d2   : > { %v475_v4 = vadd.s32 256, %v474_v3  ;;  %s491_s29 = ssub.s32 0, %s490_s28  ;;  %s1172_s30 = sshll.u32 %s486_s21, 3 }
 0x1d3   : > { %s1401_s29 = smov (!%p487_p3, %s491_s29), %s490_s28  ;;  %s1199_s3 = spop %1198 }
 0x1d4   : > { %vm476_vm9 = vcmp.eq.s32.totalorder %v33_v2, %v475_v4  ;;  %s478_s4 = scalar_lea.vmem [#allocation13], %s1168_s16  ;;  %s481_s5 = scalar_lea.vmem [#allocation14], %s1168_s16 }
 0x1d5   : > { %479 = vst.msk [vmem:[%s478_s4] sm:$0xff] %vm476_vm9, %v1236_v62  ;;  %482 = vst.msk [vmem:[%s481_s5] sm:$0xff] %vm476_vm9, %v1237_v63  ;;  %s493_s6 = sshrl.u32 %s1401_s29, 7  ;;  %s495_s7 = sand.u32 127, %s1401_s29  }
 0x1d6   : > { %s1171_s8 = sshll.u32 %s493_s6, 10  ;;  %s510_s10 = sshrl.u32 %s1199_s3, 7 }
 0x1d7   : > { %s496_s9 = sadd.s32 %s1171_s8, %s495_s7  ;;  %s512_s11 = ssub.s32 0, %s1199_s3 }
 0x1d8   : > { %v498_v5 = vstv %s496_s9  ;;  %p511_p4 = scmp.lt.s32.totalorder %s1199_s3, 0  ;;  %s1174_s12 = smin.u32 %s1199_s3, %s512_s11 }
 0x1d9   : > { %v499_v7 = vadd.s32 384, %v498_v5  ;;  %s514_s13 = sand.u32 127, %s1174_s12   ;;  %s1176_s14 = sshll.u32 %s510_s10, 3 }
 0x1da   : > { %s515_s15 = ssub.s32 0, %s514_s13  ;;  %s1201_s17 = spop %1200 }
 0x1db   : > { %vm500_vm10 = vcmp.eq.s32.totalorder %v33_v2, %v499_v7  ;;  %s502_s18 = scalar_lea.vmem [#allocation13], %s1172_s30  ;;  %s505_s16 = scalar_lea.vmem [#allocation14], %s1172_s30 }
 0x1dc   : > { %503 = vst.msk [vmem:[%s502_s18] sm:$0xff] %vm500_vm10, %v1236_v62  ;;  %506 = vst.msk [vmem:[%s505_s16] sm:$0xff] %vm500_vm10, %v1237_v63  ;;  %s1403_s15 = smov (!%p511_p4, %s515_s15), %s514_s13  ;;  %s534_s19 = sshrl.u32 %s1201_s17, 7 }
 0x1dd   : > { %s517_s20 = sshrl.u32 %s1403_s15, 7  ;;  %s519_s21 = sand.u32 127, %s1403_s15  }
 0x1de   : > { %s1175_s22 = sshll.u32 %s517_s20, 10  ;;  %s536_s23 = ssub.s32 0, %s1201_s17 }
 0x1df   : > { %s520_s24 = sadd.s32 %s1175_s22, %s519_s21  ;;  %s1178_s25 = smin.u32 %s1201_s17, %s536_s23 }
 0x1e0   : > { %v522_v8 = vstv %s520_s24  ;;  %p535_p5 = scmp.lt.s32.totalorder %s1201_s17, 0  ;;  %s538_s26 = sand.u32 127, %s1178_s25  }
 0x1e1   : > { %v523_v9 = vadd.s32 512, %v522_v8  ;;  %s539_s27 = ssub.s32 0, %s538_s26  ;;  %s1180_s28 = sshll.u32 %s534_s19, 3 }
 0x1e2   : > { %s1405_s27 = smov (!%p535_p5, %s539_s27), %s538_s26  ;;  %s1203_s29 = spop %1202 }
 0x1e3   : > { %vm524_vm11 = vcmp.eq.s32.totalorder %v33_v2, %v523_v9  ;;  %s526_s30 = scalar_lea.vmem [#allocation13], %s1176_s14  ;;  %s529_s3 = scalar_lea.vmem [#allocation14], %s1176_s14 }
 0x1e4   : > { %527 = vst.msk [vmem:[%s526_s30] sm:$0xff] %vm524_vm11, %v1236_v62  ;;  %530 = vst.msk [vmem:[%s529_s3] sm:$0xff] %vm524_vm11, %v1237_v63  ;;  %s541_s4 = sshrl.u32 %s1405_s27, 7  ;;  %s543_s5 = sand.u32 127, %s1405_s27  }
 0x1e5   : > { %s1179_s6 = sshll.u32 %s541_s4, 10  ;;  %s560_s8 = ssub.s32 0, %s1203_s29 }
 0x1e6   : > { %s544_s7 = sadd.s32 %s1179_s6, %s543_s5  ;;  %s558_s9 = sshrl.u32 %s1203_s29, 7 }
 0x1e7   : > { %v546_v10 = vstv %s544_s7  ;;  %s1182_s10 = smin.u32 %s1203_s29, %s560_s8  ;;  %p559_p6 = scmp.lt.s32.totalorder %s1203_s29, 0 }
 0x1e8   : > { %v547_v11 = vadd.s32 640, %v546_v10  ;;  %s562_s11 = sand.u32 127, %s1182_s10   ;;  %s1290_s13 = spop %1204 }
 0x1e9   : > { %s563_s12 = ssub.s32 0, %s562_s11  ;;  %s550_s14 = scalar_lea.vmem [#allocation13], %s1180_s28 }
 0x1ea   : > { %vm548_vm12 = vcmp.eq.s32.totalorder %v33_v2, %v547_v11  ;;  %s553_s15 = scalar_lea.vmem [#allocation14], %s1180_s28  ;;  %s1407_s12 = smov (!%p559_p6, %s563_s12), %s562_s11 }
 0x1eb   : > { %551 = vst.msk [vmem:[%s550_s14] sm:$0xff] %vm548_vm12, %v1236_v62  ;;  %554 = vst.msk [vmem:[%s553_s15] sm:$0xff] %vm548_vm12, %v1237_v63  ;;  %s1184_s17 = sshll.u32 %s558_s9, 3  ;;  %s565_s18 = sshrl.u32 %s1407_s12, 7 }
 0x1ec   : > { %s567_s16 = sand.u32 127, %s1407_s12   ;;  %s1183_s19 = sshll.u32 %s565_s18, 10 }
 0x1ed   : > { %s584_s20 = ssub.s32 0, %s1290_s13  ;;  %s568_s21 = sadd.s32 %s1183_s19, %s567_s16 }
 0x1ee   : > { %s1186_s22 = smin.u32 %s1290_s13, %s584_s20  ;;  %v570_v12 = vstv %s568_s21  ;;  %p583_p7 = scmp.lt.s32.totalorder %s1290_s13, 0 }
 0x1ef   : > { %s586_s23 = sand.u32 127, %s1186_s22   ;;  %v571_v13 = vadd.s32 768, %v570_v12  ;;  %s582_s25 = sshrl.u32 %s1290_s13, 7 }
 0x1f0   : > { %s587_s24 = ssub.s32 0, %s586_s23  ;;  %s574_s26 = scalar_lea.vmem [#allocation13], %s1184_s17 }
 0x1f1   : > { %s1409_s24 = smov (!%p583_p7, %s587_s24), %s586_s23  ;;  %vm572_vm13 = vcmp.eq.s32.totalorder %v33_v2, %v571_v13  ;;  %s577_s27 = scalar_lea.vmem [#allocation14], %s1184_s17 }
 0x1f2   : > { %575 = vst.msk [vmem:[%s574_s26] sm:$0xff] %vm572_vm13, %v1236_v62  ;;  %578 = vst.msk [vmem:[%s577_s27] sm:$0xff] %vm572_vm13, %v1237_v63  ;;  %s589_s28 = sshrl.u32 %s1409_s24, 7  ;;  %s591_s29 = sand.u32 127, %s1409_s24  }
 0x1f3   : > { %s1187_s30 = sshll.u32 %s589_s28, 10  ;;  %s1188_s4 = sshll.u32 %s582_s25, 3 }
 0x1f4   : > { %s592_s3 = sadd.s32 %s1187_s30, %s591_s29  ;;  %s598_s5 = scalar_lea.vmem [#allocation13], %s1188_s4 }
 0x1f5   : > { %v594_v14 = vstv %s592_s3  ;;  %s601_s6 = scalar_lea.vmem [#allocation14], %s1188_s4  ;;  %81 = sbr.rel (!%p79_p8) target bundleno = 17 (0x11), region = 152 }
 0x1f6   : > { %v595_v15 = vadd.s32 896, %v594_v14 }
 0x1f8   : > { %vm596_vm14 = vcmp.eq.s32.totalorder %v33_v2, %v595_v15  ;;  %v1309_v2 = vsub.s32 (%p79_p8), %v644_v24, %v1260_v6 }
 0x1f9   : > { %599 = vst.msk [vmem:[%s598_s5] sm:$0xff] %vm596_vm14, %v1236_v62  ;;  %602 = vst.msk [vmem:[%s601_s6] sm:$0xff] %vm596_vm14, %v1237_v63 }
 0x1fa   :  { %v648_v31 = vrot.slane (%p79_p8), %v629_v25, %v1309_v2  ;;  %v655_v32 = vrot.slane (%p79_p8), %v633_v27, %v1309_v2  ;;  %v829_v33 = vrot.slane (%p79_p8), %v631_v26, %v1309_v2  ;;  %v836_v35 = vrot.slane (%p79_p8), %v635_v29, %v1309_v2 }
 0x1fc   :  { %vm657_vm5 = vcmp.gt.s32.totalorder %v629_v25, %v648_v31  ;;  %vm658_vm6 = vcmp.eq.s32.totalorder %v629_v25, %v648_v31  ;;  %vm659_vm7 = vcmp.lt.s32.totalorder %v633_v27, %v655_v32  ;;  %vm839_vm9 = vcmp.eq.s32.totalorder %v631_v26, %v829_v33 }
 0x1fd   :  { %vm660_vm8 = vmand %vm658_vm6, %vm659_vm7  ;;  %vm840_vm10 = vcmp.lt.s32.totalorder %v635_v29, %v836_v35  ;;  %vm838_vm12 = vcmp.gt.s32.totalorder %v631_v26, %v829_v33 }
 0x1fe   :  { %vm661_vm11 = vmor %vm657_vm5, %vm660_vm8 }
 0x1ff   :  { %vm666_vm13 = vmxor %vm661_vm11, %vm1314_vm4 }
 0x200   :  { %v667_v40 = vsel %vm666_vm13, %v629_v25, %v648_v31  ;;  %v668_v41 = vsel %vm666_vm13, %v633_v27, %v655_v32  ;;  %vm841_vm14 = vmand %vm839_vm9, %vm840_vm10 }
 0x201   :  { %v676_v43 = vrot.slane %v667_v40, %v1320_v38  ;;  %v683_v44 = vrot.slane %v668_v41, %v1320_v38  ;;  %vm842_vm15 = vmor %vm838_vm12, %vm841_vm14 }
 0x202   :  { %vm847_vm1 = vmxor %vm842_vm15, %vm1314_vm4 }
 0x203   :  { %vm685_vm2 = vcmp.gt.s32.totalorder %v667_v40, %v676_v43  ;;  %vm686_vm3 = vcmp.eq.s32.totalorder %v667_v40, %v676_v43  ;;  %vm687_vm5 = vcmp.lt.s32.totalorder %v668_v41, %v683_v44  ;;  %v848_v46 = vsel %vm847_vm1, %v631_v26, %v829_v33 }
 0x204   :  { %vm688_vm6 = vmand %vm686_vm3, %vm687_vm5  ;;  %v849_v48 = vsel %vm847_vm1, %v635_v29, %v836_v35  ;;  %v857_v49 = vrot.slane %v848_v46, %v1320_v38 }
 0x205   :  { %vm689_vm7 = vmor %vm685_vm2, %vm688_vm6  ;;  %v864_v50 = vrot.slane %v849_v48, %v1320_v38  ;;  %vm1343_vm2 = vcmp.ne.s32.totalorder %v720_v51, 0 }
 0x206   :  { %vm694_vm8 = vmxor %vm689_vm7, %vm1327_vm0  ;;  %vm866_vm9 = vcmp.gt.s32.totalorder %v848_v46, %v857_v49  ;;  %vm867_vm10 = vcmp.eq.s32.totalorder %v848_v46, %v857_v49 }
 0x207   :  { %v695_v52 = vsel %vm694_vm8, %v667_v40, %v676_v43  ;;  %v696_v53 = vsel %vm694_vm8, %v668_v41, %v683_v44  ;;  %vm868_vm11 = vcmp.lt.s32.totalorder %v849_v48, %v864_v50 }
 0x208   :  { %v704_v54 = vrot.slane %v695_v52, %v1334_v47  ;;  %v711_v55 = vrot.slane %v696_v53, %v1334_v47  ;;  %vm869_vm12 = vmand %vm867_vm10, %vm868_vm11 }
 0x209   :  { %vm870_vm13 = vmor %vm866_vm9, %vm869_vm12 }
 0x20a   :  { %vm713_vm14 = vcmp.gt.s32.totalorder %v695_v52, %v704_v54  ;;  %vm714_vm15 = vcmp.eq.s32.totalorder %v695_v52, %v704_v54  ;;  %vm715_vm1 = vcmp.lt.s32.totalorder %v696_v53, %v711_v55  ;;  %vm875_vm3 = vmxor %vm870_vm13, %vm1327_vm0 }
 0x20b   :  { %vm716_vm5 = vmand %vm714_vm15, %vm715_vm1  ;;  %v876_v6 = vsel %vm875_vm3, %v848_v46, %v857_v49  ;;  %v877_v57 = vsel %vm875_vm3, %v849_v48, %v864_v50 }
 0x20c   :  { %vm717_vm6 = vmor %vm713_vm14, %vm716_vm5  ;;  %v885_v58 = vrot.slane %v876_v6, %v1334_v47  ;;  %v892_v59 = vrot.slane %v877_v57, %v1334_v47 }
 0x20d   :  { %vm722_vm7 = vmxor %vm717_vm6, %vm1343_vm2 }
 0x20e   :  { %v723_v60 = vsel %vm722_vm7, %v695_v52, %v704_v54  ;;  %v724_v61 = vsel %vm722_vm7, %v696_v53, %v711_v55  ;;  %vm894_vm8 = vcmp.gt.s32.totalorder %v876_v6, %v885_v58  ;;  %vm895_vm9 = vcmp.eq.s32.totalorder %v876_v6, %v885_v58 }
 0x20f   :  { %v738_v62 = vrot.slane %v723_v60, %v1309_v2  ;;  %v745_v63 = vrot.slane %v724_v61, %v1309_v2  ;;  %vm896_vm10 = vcmp.lt.s32.totalorder %v877_v57, %v892_v59 }
 0x210   :  { %vm897_vm11 = vmand %vm895_vm9, %vm896_vm10 }
 0x211   :  { %vm747_vm12 = vcmp.gt.s32.totalorder %v723_v60, %v738_v62  ;;  %vm748_vm13 = vcmp.eq.s32.totalorder %v723_v60, %v738_v62  ;;  %vm749_vm14 = vcmp.lt.s32.totalorder %v724_v61, %v745_v63  ;;  %vm898_vm15 = vmor %vm894_vm8, %vm897_vm11 }
 0x212   :  { %vm750_vm1 = vmand %vm748_vm13, %vm749_vm14 }
 0x213   :  { %vm751_vm3 = vmor %vm747_vm12, %vm750_vm1 }
 0x214   :  { %vm756_vm5 = vmxor %vm751_vm3, %vm1314_vm4 }
 0x215   :  { %v757_v0 = vsel %vm756_vm5, %v723_v60, %v738_v62  ;;  %v758_v1 = vsel %vm756_vm5, %v724_v61, %v745_v63  ;;  %vm903_vm6 = vmxor %vm898_vm15, %vm1343_vm2 }
 0x216   :  { %v766_v3 = vrot.slane %v757_v0, %v1320_v38  ;;  %v773_v4 = vrot.slane %v758_v1, %v1320_v38  ;;  %v904_v5 = vsel %vm903_vm6, %v876_v6, %v885_v58  ;;  %v905_v7 = vsel %vm903_vm6, %v877_v57, %v892_v59 }
 0x217   :  { %v919_v8 = vrot.slane %v904_v5, %v1309_v2  ;;  %v926_v9 = vrot.slane %v905_v7, %v1309_v2 }
 0x218   :  { %vm775_vm7 = vcmp.gt.s32.totalorder %v757_v0, %v766_v3  ;;  %vm776_vm8 = vcmp.eq.s32.totalorder %v757_v0, %v766_v3  ;;  %vm777_vm9 = vcmp.lt.s32.totalorder %v758_v1, %v773_v4 }
 0x219   :  { %vm778_vm10 = vmand %vm776_vm8, %vm777_vm9  ;;  %vm929_vm11 = vcmp.eq.s32.totalorder %v904_v5, %v919_v8  ;;  %vm930_vm12 = vcmp.lt.s32.totalorder %v905_v7, %v926_v9  ;;  %vm928_vm14 = vcmp.gt.s32.totalorder %v904_v5, %v919_v8 }
 0x21a   :  { %vm779_vm13 = vmor %vm775_vm7, %vm778_vm10 }
 0x21b   :  { %vm784_vm15 = vmxor %vm779_vm13, %vm1327_vm0 }
 0x21c   :  { %v785_v10 = vsel %vm784_vm15, %v757_v0, %v766_v3  ;;  %v786_v11 = vsel %vm784_vm15, %v758_v1, %v773_v4  ;;  %vm931_vm1 = vmand %vm929_vm11, %vm930_vm12 }
 0x21d   :  { %v794_v12 = vrot.slane %v785_v10, %v1334_v47  ;;  %v801_v13 = vrot.slane %v786_v11, %v1334_v47  ;;  %vm932_vm3 = vmor %vm928_vm14, %vm931_vm1 }
 0x21e   :  { %vm937_vm5 = vmxor %vm932_vm3, %vm1314_vm4 }
 0x21f   :  { %vm803_vm6 = vcmp.gt.s32.totalorder %v785_v10, %v794_v12  ;;  %vm804_vm8 = vcmp.eq.s32.totalorder %v785_v10, %v794_v12  ;;  %vm805_vm9 = vcmp.lt.s32.totalorder %v786_v11, %v801_v13  ;;  %v938_v14 = vsel %vm937_vm5, %v904_v5, %v919_v8 }
 0x220   :  { %vm806_vm7 = vmand %vm804_vm8, %vm805_vm9  ;;  %v939_v15 = vsel %vm937_vm5, %v905_v7, %v926_v9  ;;  %v947_v16 = vrot.slane %v938_v14, %v1320_v38 }
 0x221   :  { %vm807_vm10 = vmor %vm803_vm6, %vm806_vm7  ;;  %v954_v17 = vrot.slane %v939_v15, %v1320_v38 }
 0x222   :  { %vm812_vm11 = vmxor %vm807_vm10, %vm1343_vm2  ;;  %vm956_vm12 = vcmp.gt.s32.totalorder %v938_v14, %v947_v16  ;;  %vm957_vm13 = vcmp.eq.s32.totalorder %v938_v14, %v947_v16 }
 0x223   :  { %v813_v18 = vsel %vm812_vm11, %v785_v10, %v794_v12  ;;  %v814_v19 = vsel %vm812_vm11, %v786_v11, %v801_v13  ;;  %vm958_vm14 = vcmp.lt.s32.totalorder %v939_v15, %v954_v17 }
 0x224   :  { %816 = vst [vmem:[#allocation9] sm:$0xff] %v813_v18  ;;  %817 = vst [vmem:[#allocation11] sm:$0xff] %v814_v19 }
 0x225   :  { %vm959_vm4 = vmand %vm957_vm13, %vm958_vm14 }
 0x226   :  { %vm960_vm15 = vmor %vm956_vm12, %vm959_vm4 }
 0x227   :  { %vm965_vm1 = vmxor %vm960_vm15, %vm1327_vm0 }
 0x228   :  { %v966_v20 = vsel %vm965_vm1, %v938_v14, %v947_v16  ;;  %v967_v21 = vsel %vm965_vm1, %v939_v15, %v954_v17 }
 0x229   :  { %v975_v22 = vrot.slane %v966_v20, %v1334_v47  ;;  %v982_v23 = vrot.slane %v967_v21, %v1334_v47 }
 0x22b   :  { %vm984_vm3 = vcmp.gt.s32.totalorder %v966_v20, %v975_v22  ;;  %vm985_vm5 = vcmp.eq.s32.totalorder %v966_v20, %v975_v22  ;;  %vm986_vm6 = vcmp.lt.s32.totalorder %v967_v21, %v982_v23  ;;  %v1000_v26 = vld [vmem:[#allocation9] sm:$0xff]  ;;  %v1024_v29 = vld [vmem:[#allocation11] sm:$0xff] }
 0x22c   :  { %vm987_vm8 = vmand %vm985_vm5, %vm986_vm6  ;;  %vm1001_vm0 = vcmp.lt.s32.totalorder %v1000_v26, 0  ;;  %v1002_v27 = vsub.s32 2147483647, %v1000_v26 }
 0x22d   :  { %vm988_vm9 = vmor %vm984_vm3, %vm987_vm8 }
 0x22e   :  { %vm993_vm7 = vmxor %vm988_vm9, %vm1343_vm2  ;;  %v1003_v28 = vsel %vm1001_vm0, %v1002_v27, %v1000_v26 }
 0x22f   :  { %v994_v24 = vsel %vm993_vm7, %v966_v20, %v975_v22  ;;  %v995_v25 = vsel %vm993_vm7, %v967_v21, %v982_v23  ;;  %1004 = vst [vmem:[#allocation9] sm:$0xff] %v1003_v28  ;;  %1006 = vxpose.xlu0.b32.start.end [1/1] (short) (narrow) %v1003_v28, 8 }
 0x230   :  { %997 = vst [vmem:[#allocation10] sm:$0xff] %v994_v24  ;;  %998 = vst [vmem:[#allocation12] sm:$0xff] %v995_v25 }
 0x233   :  { %1025 = vxpose.xlu0.b32.start.end [1/1] (short) (narrow) %v1024_v29, 8 }
 0x2af   :  { %v1007_v2 = vpop.trf.xlu0 }
 0x2b0   :  { %1071 = vst [vmem:[%s1386_s1] sm:$0xff] %v1007_v2 }
 0x2b3   :  { %v1026_v30 = vpop.trf.xlu0 }
 0x2b4   :  { %1103 = vst [vmem:[%s1387_s2] sm:$0xff] %v1026_v30 }

// kernel: _device_forward.1
= control target key start
LH: loop header
LB: loop body
LE: loop exit
PB: predicated region body
PF: predicated region fallthrough
CT: control target
= control target key end

     0   :  { %vm134_vm0 = vcmask 261120   ;;  %vm18_vm1 = vcmask 7168   ;;  %v356_v25 = vmov -inf   ;;  %v227_v26 = vlaneseq  ;;  %s462_s1 = inlined_call_operand.vmem [shape: bf16[256,32], index: 1, kind: input, shape index: {}]   ;;  %s463_s0 = inlined_call_operand.vmem [shape: bf16[8,32], index: 0, kind: input, shape index: {}]   ;;  %s464_s2 = inlined_call_operand.vmem [shape: f32[8,256], index: 2, kind: output, shape index: {0}]   ;;  %s465_s3 = inlined_call_operand.vmem [shape: f32[8,1], index: 3, kind: output, shape index: {1}]  }
   0x1   :  { %v332_v0 = vld [vmem:[%s462_s1 + $0x40] sm:$0xff]   ;;  %v334_v2 = vld [vmem:[%s462_s1 + $0x48] sm:$0xff]   ;;  %v336_v6 = vld [vmem:[%s462_s1 + $0x50] sm:$0xff]   ;;  %19 = vst.msk [vmem:[#allocation2] sm:$0xff] %vm18_vm1, %v356_v25  ;;  %v357_v35 = vmov 0   ;;  %v358_v36 = vmov 0.0  }
   0x2   :  { %v333_v1 = vld [vmem:[%s462_s1] sm:$0xff]   ;;  %320 = vmatprep.subr.msk.bf16.mxu0 %vm134_vm0, %v332_v0  ;;  %v335_v4 = vld [vmem:[%s462_s1 + $0x8] sm:$0xff]   ;;  %v337_v7 = vld [vmem:[%s462_s1 + $0x10] sm:$0xff]   ;;  %v228_v27 = vand.u32 127, %v227_v26  ;;  %331 = vset.pattern.permute.xlu0 %v357_v35  ;;  %20 = vst.msk [vmem:[#allocation3] sm:$0xff] %vm18_vm1, %v358_v36 }
   0x3   :  { %v139_v3 = vsel %vm134_vm0, %v333_v1, 0  ;;  %v142_v5 = vsel %vm134_vm0, %v335_v4, 0  ;;  %v21_v8 = vld [vmem:[%s463_s0] sm:$0xf]  ;;  %v145_v9 = vsel %vm134_vm0, %v337_v7, 0  ;;  %v338_v10 = vld [vmem:[%s462_s1 + $0x58] sm:$0xff]  }
   0x4   :  { %303 = vmatpush3.bf16.xpose.msra.mxu0 %v139_v3  ;;  %318 = vmatprep.mubr.msk.bf16.mxu0 %vm134_vm0, %v21_v8  ;;  %v339_v11 = vld [vmem:[%s462_s1 + $0x18] sm:$0xff]   ;;  %v340_v13 = vld [vmem:[%s462_s1 + $0x60] sm:$0xff]   ;;  %v342_v16 = vld [vmem:[%s462_s1 + $0x68] sm:$0xff]   ;;  %v229_v28 = vadd.s32 128, %v228_v27 }
   0x5   :  { %321 = vmatprep.subr.msk.bf16.mxu0 %vm134_vm0, %v334_v2  ;;  %v148_v12 = vsel %vm134_vm0, %v339_v11, 0  ;;  %v341_v14 = vld [vmem:[%s462_s1 + $0x20] sm:$0xff]   ;;  %v343_v17 = vld [vmem:[%s462_s1 + $0x28] sm:$0xff]   ;;  %v344_v19 = vld [vmem:[%s462_s1 + $0x70] sm:$0xff]  }
   0x6   :  { %v151_v15 = vsel %vm134_vm0, %v341_v14, 0  ;;  %v154_v18 = vsel %vm134_vm0, %v343_v17, 0  ;;  %v345_v20 = vld [vmem:[%s462_s1 + $0x30] sm:$0xff]   ;;  %v346_v22 = vld [vmem:[%s462_s1 + $0x78] sm:$0xff]   ;;  %vm235_vm2 = vcmp.lt.s32.totalorder %v229_v28, 200 }
   0x7   :  { %v157_v21 = vsel %vm134_vm0, %v345_v20, 0  ;;  %v347_v23 = vld [vmem:[%s462_s1 + $0x38] sm:$0xff]  }
   0x8   :  { %v160_v24 = vsel %vm134_vm0, %v347_v23, 0  ;;  %v240_v37 = vld [vmem:[#allocation2] sm:$0xff] }
   0x9   :  { %v245_v51 = vld [vmem:[#allocation3] sm:$0xff] }
   0xc   :  { %305 = vmatpush3.bf16.xpose.msra.mxu0 %v142_v5 }
   0xd   :  { %322 = vmatprep.subr.msk.bf16.mxu0 %vm134_vm0, %v336_v6 }
  0x14   :  { %307 = vmatpush3.bf16.xpose.msra.mxu0 %v145_v9 }
  0x15   :  { %323 = vmatprep.subr.msk.bf16.mxu0 %vm134_vm0, %v338_v10 }
  0x1c   :  { %309 = vmatpush3.bf16.xpose.msra.mxu0 %v148_v12 }
  0x1d   :  { %324 = vmatprep.subr.msk.bf16.mxu0 %vm134_vm0, %v340_v13 }
  0x24   :  { %311 = vmatpush3.bf16.xpose.msra.mxu0 %v151_v15 }
  0x25   :  { %325 = vmatprep.subr.msk.bf16.mxu0 %vm134_vm0, %v342_v16 }
  0x2c   :  { %313 = vmatpush3.bf16.xpose.msra.mxu0 %v154_v18 }
  0x2d   :  { %326 = vmatprep.subr.msk.bf16.mxu0 %vm134_vm0, %v344_v19 }
  0x34   :  { %315 = vmatpush3.bf16.xpose.msra.mxu0 %v157_v21 }
  0x35   :  { %327 = vmatprep.subr.msk.bf16.mxu0 %vm134_vm0, %v346_v22 }
  0x3c   :  { %317 = vmatpush3.bf16.xpose.msra.mxu0 %v160_v24 }
  0x43   :  { %319 = vmatmul.mubr.msk.bf16.vlgmr.msra.gmra.mrb[0].mxu0 %vm134_vm0, %v21_v8 }
 0x116   :  { %v220_v29 = vpop.f32.mrb[0].mxu0 }
 0x117   :  { %238 = vst [vmem:[%s464_s2] sm:$0xff] %v220_v29  ;;  %v222_v30 = vpop.f32.mrb[1].mxu0 }
 0x118   :  { %v237_v31 = vsel %vm235_vm2, %v222_v30, -inf  ;;  %v224_v32 = vpop.f32.mrb[2].mxu0 }
 0x119   :  { %239 = vst [vmem:[%s464_s2 + $0x8] sm:$0xff] %v237_v31  ;;  %v225_v33 = vpop.f32.mrb[3].mxu0  ;;  %v241_v34 = vmax.f32 %v220_v29, %v237_v31 }
 0x11b   :  { %242 = vmax.xlane.f32.xlu0 %v241_v34 }
 0x1a8   :  { %v243_v38 = vpop.xlane.xlu0 %242 }
 0x1a9   :  { %v244_v39 = vmax.f32 %v240_v37, %v243_v38 }
 0x1ab   :  { %v246_v40 = vsub.f32 %v240_v37, %v244_v39  ;;  %267 = vst.msk [vmem:[#allocation2] sm:$0xff] %vm18_vm1, %v244_v39  ;;  %252 = vperm.xlu0 %331, %v244_v39  }
 0x1ad   :  { %v247_v49 = vmul.f32 1.442695, %v246_v40 }
 0x1b2   :  { %v271_v58 = vld [vmem:[#allocation2] sm:$0xff] }
 0x22a   :  { %v253_v41 = vpop.permute.xlu0 %252 }
 0x22b   :  { %v255_v42 = vsub.f32 %v220_v29, %v253_v41  ;;  %v256_v43 = vsub.f32 %v237_v31, %v253_v41 }
 0x22d   :  { %v257_v44 = vmul.f32 1.442695, %v255_v42  ;;  %v259_v45 = vmul.f32 1.442695, %v256_v43 }
 0x22f   :  { %348 = vpow2.f32 %v257_v44 }
 0x230   :  { %350 = vpow2.f32 %v259_v45 }
 0x231   :  { %352 = vpow2.f32 %v247_v49 }
 0x239   :  { %v349_v46 = vpop.eup %348 }
 0x23a   :  { %v351_v47 = vpop.eup %350 }
 0x23b   :  { %v261_v48 = vadd.f32 %v351_v47, %v349_v46  ;;  %v353_v50 = vpop.eup %352 }
 0x23c   :  { %v249_v52 = vmul.f32 %v353_v50, %v245_v51 }
 0x23d   :  { %262 = vadd.xlane.f32.xlu1 %v261_v48 }
 0x2ca   :  { %v263_v53 = vpop.xlane.xlu1 %262 }
 0x2cb   :  { %v264_v54 = vadd.f32 %v263_v53, %v249_v52 }
 0x2cd   :  { %266 = vst.msk [vmem:[#allocation3] sm:$0xff] %vm18_vm1, %v264_v54 }
 0x2d4   :  { %v272_v55 = vld [vmem:[#allocation3] sm:$0xff] }
 0x2d5   :  { %354 = vlog2.f32 %v272_v55 }
 0x2df   :  { %v355_v56 = vpop.eup %354 }
 0x2e0   :  { %v274_v57 = vmul.f32 0.6931472, %v355_v56 }
 0x2e2   :  { %v275_v59 = vadd.f32 %v274_v57, %v271_v58 }
 0x2e4   :  { %276 = vst.msk [vmem:[%s465_s3] sm:$0xff] %vm18_vm1, %v275_v59 }

</bundles_post_ra>
